<compile_context>
chip_gen: v5e
topology: v5e:2x2
jax: 0.10.0
libtpu: 0.0.40
codegen_flags: <defaults>
</compile_context>

<pallas_src>
import jax
import jax.numpy as jnp
from jax.experimental import pallas as pl
from jax.experimental.pallas import tpu as pltpu


# ----------------------------------------------------------------------------
# Device-derived budgets
# ----------------------------------------------------------------------------
def _vmem_capacity_bytes() -> int:
    """Physical VMEM of the attached TPU; conservative fallback if unknown."""
    try:
        return int(pltpu.get_tpu_info().vmem_capacity_bytes)
    except Exception:
        return 64 * 1024 * 1024  # v7x per-TensorCore VMEM (smallest in the fleet)


# ----------------------------------------------------------------------------
# Row-wise multiplier, mirroring the PyTorch backward:
#   mul_raw = sf / rms(g_row)         (nan -> small, +/-inf -> fmax/fmin)
#   mul_ok  = mul_raw if mul_raw < small*1000 else small
#   mul     = mul_ok  if rms > epi              else small
# rms is never materialized: sf/rms == sf * rsqrt(sumsq/F), and
# rms <= epi  <=>  sumsq <= epi^2 * F  (epi >= 0).
# ----------------------------------------------------------------------------
def _compute_row_mul(sumsq_b_1, sf, epi, small, out_features: float):
    # TODO(synk): PyTorch does this reduction/divide in float64; TPU VPU is f32,
    # so bit-parity with the reference is not guaranteed (rsqrt is also EUP).
    finfo = jnp.finfo(jnp.float32)
    mul_raw_b_1 = sf * jax.lax.rsqrt(sumsq_b_1 * (1.0 / out_features))
    mul_raw_b_1 = jnp.where(jnp.isnan(mul_raw_b_1), small, mul_raw_b_1)
    mul_raw_b_1 = jnp.where(mul_raw_b_1 == jnp.inf, finfo.max, mul_raw_b_1)
    mul_raw_b_1 = jnp.where(mul_raw_b_1 == -jnp.inf, finfo.min, mul_raw_b_1)
    mul_ok_b_1 = jnp.where(mul_raw_b_1 < (small * 1000.0), mul_raw_b_1, small)
    too_small_b_1 = sumsq_b_1 <= (epi * epi * out_features)
    return jnp.where(too_small_b_1, small, mul_ok_b_1)


# ----------------------------------------------------------------------------
# Single-pass kernel: whole feature row resident in VMEM (common case).
# ----------------------------------------------------------------------------
def _grad_mod_bwd_kernel(sf_ref, epi_ref, small_ref, g_ref, o_ref):
    out_features = float(g_ref.shape[-1])
    g32 = g_ref[...].astype(jnp.float32)
    sumsq_b_1 = jnp.sum(g32 * g32, axis=-1, keepdims=True)
    mul_b_1 = _compute_row_mul(sumsq_b_1, sf_ref[0], epi_ref[0], small_ref[0],
                               out_features)
    # Multiply in the gradient's own dtype (mirrors PyTorch's `.to(g.dtype)`)
    # and re-read g_ref, so the f32 copy used only for the reduction does not
    # have to stay live across the store (halves VMEM temp pressure for bf16).
    o_ref[...] = g_ref[...] * mul_b_1.astype(o_ref.dtype)


# ----------------------------------------------------------------------------
# Wide-feature fallback (F too large for a (pack, F) tile): two passes.
#   pass 1: accumulate per-row sum-of-squares across feature blocks, finalize
#           into the row multiplier (accumulated directly in the output block)
#   pass 2: scale each (rows, features) block by its row multiplier
# ----------------------------------------------------------------------------
def _make_rowmul_kernel(f_total: int, tf: int):
    needs_mask = (f_total % tf) != 0

    def kernel(sf_ref, epi_ref, small_ref, g_ref, mul_ref):
        j = pl.program_id(1)

        @pl.when(j == 0)
        def _():
            mul_ref[...] = jnp.zeros_like(mul_ref)

        g32 = g_ref[...].astype(jnp.float32)
        if needs_mask:
            # Last feature block is partial: zero the padded lanes so they do
            # not pollute the row sum of squares.
            col = jax.lax.broadcasted_iota(jnp.int32, g32.shape, 1) + j * tf
            g32 = jnp.where(col < f_total, g32, 0.0)
        mul_ref[...] += jnp.sum(g32 * g32, axis=-1, keepdims=True)

        @pl.when(j == pl.num_programs(1) - 1)
        def _():
            sumsq_b_1 = mul_ref[...]
            mul_ref[...] = _compute_row_mul(sumsq_b_1, sf_ref[0], epi_ref[0],
                                            small_ref[0], float(f_total))

    return kernel


def _scale_kernel(g_ref, mul_ref, o_ref):
    o_ref[...] = g_ref[...] * mul_ref[...].astype(o_ref.dtype)


# ----------------------------------------------------------------------------
# Backward dispatcher
# ----------------------------------------------------------------------------
def _backward_pallas(g: jax.Array, sf: jax.Array, epi: jax.Array,
                     small: jax.Array, *,
                     tile_budget_bytes_override: int | None = None) -> jax.Array:
    B, F = g.shape
    itemsize = jnp.dtype(g.dtype).itemsize

    vmem = _vmem_capacity_bytes()
    # Double-buffered in + out (4x tile) must stay well under the scoped limit.
    vmem_limit = min((vmem * 3) // 4, 96 * 1024 * 1024)
    tile_budget = tile_budget_bytes_override
    if tile_budget is None:
        # ~8 MiB/tile on v7x (64 MiB VMEM), ~16 MiB/tile on v5e/v6e (128 MiB).
        tile_budget = max(4 * 1024 * 1024, vmem // 8)

    # Row tile aligned to the dtype's sublane pack: f32->8, bf16->16, int8->32.
    pack = max(8, 32 // itemsize)
    min_rows = min(B, pack)

    # TODO(synk): if F is not a multiple of 128, padding features to a
    # lane-dense multiple of 128 at the model level would avoid masked partial
    # stores; correctness does not require it here.
    # TODO(synk): on v7x, verify whether ("parallel",) actually shards this
    # 1-D grid across both TensorCores; if not, pltpu.CORE_PARALLEL / a
    # pl.core_map split would be the next step (not applied blindly here so
    # the kernel keeps compiling on every generation).

    if min_rows * F * itemsize <= tile_budget:
        # -------- single-pass path: full feature row per block --------
        rows = tile_budget // max(1, F * itemsize)
        if rows >= B:
            TB = B                                   # full extent (any B allowed)
        else:
            TB = max(pack, (rows // pack) * pack)    # sublane-pack multiple
        grid = (pl.cdiv(B, TB),)

        return pl.pallas_call(
            _grad_mod_bwd_kernel,
            out_shape=jax.ShapeDtypeStruct((B, F), g.dtype),
            grid_spec=pltpu.PrefetchScalarGridSpec(
                num_scalar_prefetch=0,
                grid=grid,
                in_specs=[
                    pl.BlockSpec(memory_space=pltpu.SMEM),    # scaling_factor (1,)
                    pl.BlockSpec(memory_space=pltpu.SMEM),    # epi            (1,)
                    pl.BlockSpec(memory_space=pltpu.SMEM),    # mul_me_when_g_too_small
                    pl.BlockSpec((TB, F), lambda i: (i, 0)),  # g_in [batch, features]
                ],
                out_specs=pl.BlockSpec((TB, F), lambda i: (i, 0)),
            ),
            compiler_params=pltpu.CompilerParams(
                dimension_semantics=("parallel",),
                vmem_limit_bytes=vmem_limit,
            ),
        )(sf, epi, small, g)

    # -------- wide-feature fallback: two passes over HBM --------
    TB = min(B, pack)
    TF = max(128, ((tile_budget // max(1, TB * itemsize)) // 128) * 128)
    TF = min(TF, F)
    nb, nf = pl.cdiv(B, TB), pl.cdiv(F, TF)

    # Pass 1: per-row sum of squares -> row multiplier (f32, shape [B, 1]).
    mul_b_1 = pl.pallas_call(
        _make_rowmul_kernel(F, TF),
        out_shape=jax.ShapeDtypeStruct((B, 1), jnp.float32),
        grid_spec=pltpu.PrefetchScalarGridSpec(
            num_scalar_prefetch=0,
            grid=(nb, nf),
            in_specs=[
                pl.BlockSpec(memory_space=pltpu.SMEM),
                pl.BlockSpec(memory_space=pltpu.SMEM),
                pl.BlockSpec(memory_space=pltpu.SMEM),
                pl.BlockSpec((TB, TF), lambda i, j: (i, j)),
            ],
            out_specs=pl.BlockSpec((TB, 1), lambda i, j: (i, 0)),  # resident over j
        ),
        compiler_params=pltpu.CompilerParams(
            dimension_semantics=("parallel", "arbitrary"),
            vmem_limit_bytes=vmem_limit,
        ),
    )(sf, epi, small, g)

    # Pass 2: scale each block by its row multiplier.
    return pl.pallas_call(
        _scale_kernel,
        out_shape=jax.ShapeDtypeStruct((B, F), g.dtype),
        grid_spec=pltpu.PrefetchScalarGridSpec(
            num_scalar_prefetch=0,
            grid=(nb, nf),
            in_specs=[
                pl.BlockSpec((TB, TF), lambda i, j: (i, j)),
                pl.BlockSpec((TB, 1), lambda i, j: (i, 0)),
            ],
            out_specs=pl.BlockSpec((TB, TF), lambda i, j: (i, j)),
        ),
        compiler_params=pltpu.CompilerParams(
            dimension_semantics=("parallel", "parallel"),
            vmem_limit_bytes=vmem_limit,
        ),
    )(g, mul_b_1)


# ----------------------------------------------------------------------------
# custom_vjp wiring: forward is a pure identity (no kernel, no copy);
# backward is the Pallas row-rescale kernel.
# ----------------------------------------------------------------------------
@jax.custom_vjp
def gradient_modification_v2(x, scaling_factor, epi, mul_me_when_g_too_small):
    return x


def _gm_fwd(x, scaling_factor, epi, mul_me_when_g_too_small):
    return x, (scaling_factor, epi, mul_me_when_g_too_small)


def _gm_bwd(res, g_in_b_o):
    scaling_factor, epi, mul_me_when_g_too_small = res
    g_out_b_o = _backward_pallas(g_in_b_o, scaling_factor, epi,
                                 mul_me_when_g_too_small)
    return (g_out_b_o,
            jnp.zeros_like(scaling_factor),
            jnp.zeros_like(epi),
            jnp.zeros_like(mul_me_when_g_too_small))


gradient_modification_v2.defvjp(_gm_fwd, _gm_bwd)


class GradientModificationV2:
    """JAX mirror of GradientModification_v2. Non-trainable scalar params are
    initialized deterministically exactly like the PyTorch __init__."""

    def __init__(self, scaling_factor: float = 1.0, epi: float = 1e-5,
                 mul_me_when_g_too_small: float = 1000.0):
        self.scaling_factor = jnp.array([scaling_factor], dtype=jnp.float32)
        self.epi = jnp.array([epi], dtype=jnp.float32)
        self.mul_me_when_g_too_small = jnp.array(
            [mul_me_when_g_too_small], dtype=jnp.float32)

    def set_scaling_factor(self, scaling_factor: float) -> None:
        self.scaling_factor = jnp.array([scaling_factor], dtype=jnp.float32)

    def scale_scaling_factor(self, by: float) -> None:
        self.scaling_factor = self.scaling_factor * by

    def set_epi(self, epi: float) -> None:
        self.epi = jnp.array([epi], dtype=jnp.float32)

    def set_mul_me_when_g_too_small(self, v: float) -> None:
        self.mul_me_when_g_too_small = jnp.array([v], dtype=jnp.float32)

    def __call__(self, x: jax.Array) -> jax.Array:
        if x.ndim != 2:
            raise Exception("GradientModification only accept rank-2 tensor. "
                            "The shape should be [batch, something]")
        return gradient_modification_v2(x, self.scaling_factor, self.epi,
                                        self.mul_me_when_g_too_small)


if __name__ == "__main__":
    key = jax.random.PRNGKey(0)
    batch, features = 8, 256
    kx, ku = jax.random.split(key)
    x = jax.random.normal(kx, (batch, features), dtype=jnp.float32)
    upstream = jax.random.normal(ku, (batch, features), dtype=jnp.float32)
    # Row 0 carries a tiny gradient -> exercises the `mul_me_when_g_too_small` branch.
    upstream = upstream.at[0].set(1e-7)

    mod = GradientModificationV2()  # scaling_factor=1.0, epi=1e-5, small=1000.0

    # Forward: identity (no kernel, no copy).
    y = mod(x)
    jax.block_until_ready(y)
    assert y.shape == x.shape
    assert jnp.array_equal(y, x)

    # Backward through jax.grad exercises the Pallas single-pass kernel.
    def loss_fn(xx):
        return jnp.sum(mod(xx) * upstream)

    gx = jax.grad(loss_fn)(x)
    jax.block_until_ready(gx)

    # Pure-JAX reference of the backward semantics.
    def ref_bwd(g, sf, epi, small):
        F = jnp.float32(g.shape[-1])
        avg = jnp.sqrt(jnp.sum(g * g, axis=-1, keepdims=True) / F)
        raw = sf / avg
        fin = jnp.finfo(jnp.float32)
        raw = jnp.where(jnp.isnan(raw), small, raw)
        raw = jnp.where(raw == jnp.inf, fin.max, raw)
        raw = jnp.where(raw == -jnp.inf, fin.min, raw)
        ok = jnp.where(raw < small * 1000.0, raw, small)
        mul = jnp.where(avg <= epi, small, ok)
        return g * mul

    expected = ref_bwd(upstream, mod.scaling_factor[0], mod.epi[0],
                       mod.mul_me_when_g_too_small[0])
    assert jnp.allclose(gx, expected, rtol=2e-3, atol=1e-6), \
        "backward (single-pass) mismatch"

    # Force the wide-feature two-pass fallback with a tiny tile budget; also
    # uses a non-128-multiple F so the feature-mask path in pass 1 is covered.
    g_wide = jax.random.normal(jax.random.PRNGKey(2), (batch, 320),
                               dtype=jnp.float32)
    got_wide = _backward_pallas(g_wide, mod.scaling_factor, mod.epi,
                                mod.mul_me_when_g_too_small,
                                tile_budget_bytes_override=4096)
    jax.block_until_ready(got_wide)
    exp_wide = ref_bwd(g_wide, mod.scaling_factor[0], mod.epi[0],
                       mod.mul_me_when_g_too_small[0])
    assert jnp.allclose(got_wide, exp_wide, rtol=2e-3, atol=1e-6), \
        "backward (wide-F fallback) mismatch"

    print("KERNEL_OK")
</pallas_src>

<mosaic_0001>
module attributes {stable_mosaic.version = 11 : i64} {
  func.func @_grad_mod_bwd_kernel(%arg0: i32, %arg1: memref<1xf32, #tpu.memory_space<smem>>, %arg2: memref<1xf32, #tpu.memory_space<smem>>, %arg3: memref<1xf32, #tpu.memory_space<smem>>, %arg4: memref<8x256xf32, #tpu.memory_space<vmem>>, %arg5: memref<8x256xf32, #tpu.memory_space<vmem>>) attributes {dimension_semantics = [#tpu.dimension_semantics<parallel>], iteration_bounds = array<i64: 1>, scalar_prefetch = 0 : i64, scratch_operands = 0 : i64, tpu.core_type = #tpu.core_type<tc>, window_params = [{transform_indices = @transform_0, window_bounds = array<i64: 1>}, {transform_indices = @transform_1, window_bounds = array<i64: 1>}, {transform_indices = @transform_2, window_bounds = array<i64: 1>}, {transform_indices = @transform_3, window_bounds = array<i64: 8, 256>}, {transform_indices = @transform_4, window_bounds = array<i64: 8, 256>}]} {
    %c0 = arith.constant 0 : index
    %c0_0 = arith.constant 0 : index
    %0 = vector.load %arg4[%c0, %c0_0] : memref<8x256xf32, #tpu.memory_space<vmem>>, vector<8x256xf32>
    %1 = arith.mulf %0, %0 : vector<8x256xf32>
    %cst = arith.constant dense<0.000000e+00> : vector<8xf32>
    %2 = vector.multi_reduction <add>, %1, %cst [1] : vector<8x256xf32> to vector<8xf32>
    %3 = vector.shape_cast %2 : vector<8xf32> to vector<8x1xf32>
    %c0_1 = arith.constant 0 : index
    %4 = memref.load %arg1[%c0_1] : memref<1xf32, #tpu.memory_space<smem>>
    %c0_2 = arith.constant 0 : index
    %5 = memref.load %arg2[%c0_2] : memref<1xf32, #tpu.memory_space<smem>>
    %c0_3 = arith.constant 0 : index
    %6 = memref.load %arg3[%c0_3] : memref<1xf32, #tpu.memory_space<smem>>
    %cst_4 = arith.constant 3.906250e-03 : f32
    %7 = vector.broadcast %cst_4 : f32 to vector<8x1xf32>
    %8 = arith.mulf %3, %7 : vector<8x1xf32>
    %9 = math.rsqrt %8 : vector<8x1xf32>
    %10 = vector.broadcast %4 : f32 to vector<8x1xf32>
    %11 = arith.mulf %10, %9 : vector<8x1xf32>
    %12 = arith.cmpf one, %11, %11 : vector<8x1xf32>
    %13 = vector.broadcast %6 : f32 to vector<8x1xf32>
    %14 = arith.select %12, %13, %11 : vector<8x1xi1>, vector<8x1xf32>
    %cst_5 = arith.constant 0x7F800000 : f32
    %15 = vector.broadcast %cst_5 : f32 to vector<8x1xf32>
    %16 = arith.cmpf oeq, %14, %15 : vector<8x1xf32>
    %cst_6 = arith.constant 3.40282347E+38 : f32
    %17 = vector.broadcast %cst_6 : f32 to vector<8x1xf32>
    %18 = arith.select %16, %17, %14 : vector<8x1xi1>, vector<8x1xf32>
    %cst_7 = arith.constant 0xFF800000 : f32
    %19 = vector.broadcast %cst_7 : f32 to vector<8x1xf32>
    %20 = arith.cmpf oeq, %18, %19 : vector<8x1xf32>
    %cst_8 = arith.constant -3.40282347E+38 : f32
    %21 = vector.broadcast %cst_8 : f32 to vector<8x1xf32>
    %22 = arith.select %20, %21, %18 : vector<8x1xi1>, vector<8x1xf32>
    %cst_9 = arith.constant 1.000000e+03 : f32
    %23 = arith.mulf %6, %cst_9 : f32
    %24 = vector.broadcast %23 : f32 to vector<8x1xf32>
    %25 = arith.cmpf olt, %22, %24 : vector<8x1xf32>
    %26 = vector.broadcast %6 : f32 to vector<8x1xf32>
    %27 = arith.select %25, %22, %26 : vector<8x1xi1>, vector<8x1xf32>
    %28 = arith.mulf %5, %5 : f32
    %cst_10 = arith.constant 2.560000e+02 : f32
    %29 = arith.mulf %28, %cst_10 : f32
    %30 = vector.broadcast %29 : f32 to vector<8x1xf32>
    %31 = arith.cmpf ole, %3, %30 : vector<8x1xf32>
    %32 = vector.broadcast %6 : f32 to vector<8x1xf32>
    %33 = arith.select %31, %32, %27 : vector<8x1xi1>, vector<8x1xf32>
    %c0_11 = arith.constant 0 : index
    %c0_12 = arith.constant 0 : index
    %34 = vector.load %arg4[%c0_11, %c0_12] : memref<8x256xf32, #tpu.memory_space<vmem>>, vector<8x256xf32>
    %35 = vector.broadcast %33 : vector<8x1xf32> to vector<8x256xf32>
    %36 = arith.mulf %34, %35 : vector<8x256xf32>
    %c0_13 = arith.constant 0 : index
    %c0_14 = arith.constant 0 : index
    %37 = vector.load %arg5[%c0_13, %c0_14] : memref<8x256xf32, #tpu.memory_space<vmem>>, vector<8x256xf32>
    tpu.vector_store %arg5[%c0_13, %c0_14], %36 {strides = array<i32>} : memref<8x256xf32, #tpu.memory_space<vmem>>, vector<8x256xf32>,
    return
  }
  func.func @transform_0(%arg0: i32) -> i32 {
    %c0_i32 = arith.constant 0 : i32
    %c0_i32_0 = arith.constant 0 : i32
    return %c0_i32 : i32
  }
  func.func @transform_1(%arg0: i32) -> i32 {
    %c0_i32 = arith.constant 0 : i32
    %c0_i32_0 = arith.constant 0 : i32
    return %c0_i32 : i32
  }
  func.func @transform_2(%arg0: i32) -> i32 {
    %c0_i32 = arith.constant 0 : i32
    %c0_i32_0 = arith.constant 0 : i32
    return %c0_i32 : i32
  }
  func.func @transform_3(%arg0: i32) -> (i32, i32) {
    %c0_i32 = arith.constant 0 : i32
    %c0_i32_0 = arith.constant 0 : i32
    return %arg0, %c0_i32 : i32, i32
  }
  func.func @transform_4(%arg0: i32) -> (i32, i32) {
    %c0_i32 = arith.constant 0 : i32
    %c0_i32_0 = arith.constant 0 : i32
    return %arg0, %c0_i32 : i32, i32
  }
}

</mosaic_0001>

<bundles_post_ra>
// kernel: tpu_custom_call.1
= control target key start
LH: loop header
LB: loop body
LE: loop exit
PB: predicated region body
PF: predicated region fallthrough
CT: control target
= control target key end

     0   :  { %12 = vsyncpa [#allocation6], 0  ;;  %s197_s0 = inlined_call_operand.<no memory space> [shape: f32[1], index: 0, kind: input, shape index: {}]   ;;  %s198_s1 = inlined_call_operand.<no memory space> [shape: f32[1], index: 1, kind: input, shape index: {}]   ;;  %s199_s2 = inlined_call_operand.<no memory space> [shape: f32[1], index: 2, kind: input, shape index: {}]   ;;  %s200_s3 = inlined_call_operand.hbm [shape: f32[8,256], index: 3, kind: input, shape index: {}]   ;;  %s201_s4 = inlined_call_operand.hbm [shape: f32[8,256], index: 4, kind: output, shape index: {}]  }
   0x1   :  { %13 = vsyncpa [#allocation7], 0  ;;  %s25_s17 = sshll.u32 %s200_s3, 4  ;;  %s151_s18 = smov [#allocation5]   ;;  %s26_s17 = int_to_ptr.hbm [resolvable:$true] %s25_s17 }
   0x2   :  { %s27_s19 = sshll.u32 %s151_s18, 4  ;;  %s28_s19 = int_to_ptr.vmem [resolvable:$true] %s27_s19 }
   0x3   :  { %30 = dma.hbm_to_vmem [thread:$0]  %s26_s17, 256, %s28_s19, [#allocation6]  }
   0x4   :  { %147 = dma.done.wait [#allocation6], 256  }
   0x5   :  { %148 = vsyncadd [#allocation6], 4294967040  ;;  %v35_v0 = vld [vmem:[#allocation5] sm:$0xff]  ;;  %v36_v1 = vld [vmem:[#allocation5 + $0x8] sm:$0xff]  ;;  %v56_v13 = vstv %s197_s0  ;;  %s69_s23 = smul.f32 %s198_s1, %s198_s1  ;;  %v59_v16 = vstv %s199_s2  ;;  %s152_s0 = smov [#allocation8]  }
   0x6   :  { %v37_v2 = vmul.f32 %v35_v0, %v35_v0  ;;  %v38_v3 = vmul.f32 %v36_v1, %v36_v1  ;;  %s65_s28 = smul.f32 1000.0, %s199_s2  ;;  %s83_s1 = sshll.u32 %s152_s0, 4  ;;  %s84_s1 = int_to_ptr.vmem [resolvable:$true] %s83_s1 }
   0x7   :  { %s70_s29 = smul.f32 256.0, %s69_s23  ;;  %s85_s6 = sshll.u32 %s201_s4, 4  ;;  %s86_s6 = int_to_ptr.hbm [resolvable:$true] %s85_s6 }
   0x8   :  { %v39_v4 = vadd.f32 %v38_v3, %v37_v2  ;;  %v66_v19 = vstv %s65_s28 }
   0x9   :  { %v71_v20 = vstv %s70_s29 }
   0xa   :  { %40 = vadd.xlane.f32.xlu0 %v39_v4 }
  0x7d   :  { %v41_v5 = vpop.xlane.xlu0 %40 }
  0x7e   :  { %v45_v6 = vmul.f32 0.00390625, %v41_v5  ;;  %vm72_vm7 = vcmp.le.f32.partialorder %v41_v5, %v71_v20 }
  0x80   :  { %97 = vrsqrt.f32 %v45_v6  ;;  %vm52_vm1 = vweird.f32 %v45_v6 }
  0x86   :  { %v98_v7 = vpop.eup %97 }
  0x87   :  { %v47_v8 = vmul.f32 %v98_v7, %v45_v6  ;;  %vm53_vm0 = vweird.f32 %v98_v7 }
  0x88   :  { %vm54_vm2 = vmor %vm52_vm1, %vm53_vm0 }
  0x89   :  { %v48_v9 = vmul.f32 %v98_v7, %v47_v8 }
  0x8b   :  { %v49_v10 = vmul.f32 0.5, %v48_v9 }
  0x8d   :  { %v50_v11 = vsub.f32 1.5, %v49_v10 }
  0x8f   :  { %v51_v12 = vmul.f32 %v98_v7, %v50_v11 }
  0x91   :  { %v55_v14 = vsel %vm54_vm2, %v98_v7, %v51_v12 }
  0x92   :  { %v57_v15 = vmul.f32 %v56_v13, %v55_v14 }
  0x94   :  { %vm58_vm3 = vcmp.ne.f32.partialorder %v57_v15, %v57_v15 }
  0x95   :  { %v60_v17 = vsel %vm58_vm3, %v59_v16, %v57_v15 }
  0x96   :  { %vm61_vm4 = vcmp.eq.f32.partialorder %v60_v17, inf }
  0x97   :  { %v62_v18 = vsel %vm61_vm4, 3.4028235e+38, %v60_v17 }
  0x98   :  { %vm63_vm5 = vcmp.eq.f32.partialorder %v62_v18, -inf }
  0x99   :  { %v64_v21 = vsel %vm63_vm5, -3.4028235e+38, %v62_v18 }
  0x9a   :  { %vm67_vm6 = vcmp.lt.f32.partialorder %v64_v21, %v66_v19 }
  0x9b   :  { %v68_v22 = vsel %vm67_vm6, %v64_v21, %v59_v16 }
  0x9c   :  { %v73_v23 = vsel %vm72_vm7, %v59_v16, %v68_v22 }
  0x9d   :  { %v74_v24 = vmul.f32 %v73_v23, %v35_v0  ;;  %v75_v25 = vmul.f32 %v73_v23, %v36_v1 }
  0x9f   :  { %76 = vst [vmem:[#allocation8] sm:$0xff] %v74_v24 }
  0xa0   :  { %77 = vst [vmem:[#allocation8 + $0x8] sm:$0xff] %v75_v25 }
  0xa1   :  { %88 = dma.vmem_to_hbm [thread:$0]  %s84_s1, 256, %s86_s6, [#allocation7]  }
  0xa2   :  { %149 = dma.done.wait [#allocation7], 256  }
  0xa3   :  { %150 = vsyncadd [#allocation7], 4294967040 }
  0xa4   :  { %93 = vsyncpa [#allocation6], 1 }
  0xa5   :  { %94 = vsyncpa [#allocation7], 1 }

</bundles_post_ra>
